<compile_context>
chip_gen: v5e
topology: v5e:2x2
jax: 0.10.0
libtpu: 0.0.40
codegen_flags: <defaults>
</compile_context>

<pallas_src>
import functools

import jax
import jax.numpy as jnp
from jax.experimental import pallas as pl
from jax.experimental.pallas import tpu as pltpu

ALPHA = 0.8
GAMMA = 2.0
_LOG_CLAMP = -100.0                 # torch's binary_cross_entropy clamps log terms at -100
_TARGET_BLOCK_BYTES = 2 << 20       # ~2 MiB of *input dtype* HBM traffic per input per step


def _tensorcores_per_device():
    """Best-effort count of TensorCores a single Pallas kernel can use."""
    try:
        dev = jax.devices()[0]
        if dev.platform != "tpu":
            return 1
        kind = dev.device_kind.lower()
    except Exception:
        return 1
    # Single-TC-per-device generations: v2/v3 (one JAX device per core) and
    # the "lite" chips (v5e, v6e).  Megacore (v4, v5p) and v7x expose 2 TCs.
    if any(s in kind for s in ("v2", "v3", "lite", "v5e", "v6e")):
        return 1
    return 2


def _pick_cols(n, sub):
    """Lane-aligned column count; prefer exact divisors (free reshape, no copy)."""
    for cand in (512, 256, 128):
        if n % cand == 0 and n // cand >= sub:
            return cand
    for cand in (512, 256, 128):
        if n % cand == 0:
            return cand
    return 128


def _bce_sum_kernel(p_ref, t_ref, out_ref, acc_ref, *,
                    spc, total_blocks, last_rows, sub, has_overhang):
    """Accumulate the sum of elementwise BCE over this core's chunk of blocks.

    grid = (ncores, steps_per_core): axis 0 is 'parallel' (core shard), axis 1
    is the reduction axis.  acc_ref is a fixed (sub, cols) (or (rows, cols)
    for a sub-tile single block) f32 buffer; per-step work is pure VALU adds.
    """
    c = pl.program_id(0)
    i = pl.program_id(1)
    blk = c * spc + i
    br, cols = p_ref.shape
    ragged = last_rows != br            # static

    @pl.when(i == 0)
    def _init():
        acc_ref[...] = jnp.zeros_like(acc_ref)

    def accumulate(mask_rows):
        p = p_ref[...].astype(jnp.float32)
        t = t_ref[...].astype(jnp.float32)
        # Elementwise BCE with torch-style clamp of each log term at -100.
        # NOTE: torch uses log1p(-p); jnp.log(1 - p) differs by <= ~1 ulp for
        # p near 0 and hits the same -100 clamp for p near 1.  We keep log()
        # since it is a guaranteed Mosaic lowering.
        log_p = jnp.maximum(jnp.log(p), _LOG_CLAMP)
        log_1mp = jnp.maximum(jnp.log(1.0 - p), _LOG_CLAMP)
        bce = -(t * log_p + (1.0 - t) * log_1mp)
        if mask_rows:
            # Only the single ragged last block pays for the iota/compare/
            # select; interior blocks never execute this path at runtime.
            row = jax.lax.broadcasted_iota(jnp.int32, (br, cols), 0)
            bce = jnp.where(row < last_rows, bce, 0.0)
        if br % sub == 0:
            # Fixed-size accumulator: fold the block's rows into `sub` rows
            # with pure VALU adds (no XLU); acc VMEM stays (sub, cols)
            # regardless of how large the block grows.
            acc_ref[...] += bce.reshape(br // sub, sub, cols).sum(axis=0)
        else:
            # Only possible for a single full-extent block smaller than one
            # sublane tile; acc has the block's own shape in that case.
            acc_ref[...] += bce

    def step():
        if ragged:
            @pl.when(blk == total_blocks - 1)
            def _last():
                accumulate(True)

            @pl.when(blk < total_blocks - 1)
            def _interior():
                accumulate(False)
        else:
            accumulate(False)

    if has_overhang:
        # Over-provisioned clamped duplicate steps on the last core: skip the
        # compute entirely instead of computing-then-zeroing.
        @pl.when(blk < total_blocks)
        def _real():
            step()
    else:
        step()

    @pl.when(i == pl.num_programs(1) - 1)
    def _finalize():
        # One cross-lane/sublane reduce per core, at the very end.
        out_ref[...] = jnp.sum(acc_ref[...]).reshape(1, 1, 1)


@functools.partial(jax.jit, static_argnames=("alpha", "gamma"))
def focal_loss(inputs, targets, alpha=ALPHA, gamma=GAMMA):
    """Pallas TPU implementation of FocalLoss(alpha, gamma, reduction='mean')."""
    assert inputs.shape == targets.shape
    n = inputs.size
    assert n > 0

    p_flat = inputs.reshape(-1)
    t_flat = targets.reshape(-1)

    itemsize = inputs.dtype.itemsize
    sub = {4: 8, 2: 16, 1: 32}.get(itemsize, 8)   # sublane tile of the input dtype

    cols = _pick_cols(n, sub)
    rows = n // cols
    n_main = rows * cols
    tail = n - n_main

    bce_sum = jnp.float32(0.0)

    if rows > 0:
        if tail:
            # Ragged numel: run the kernel on the cols-aligned prefix.  (The
            # prefix slice materializes a copy in XLA; cheaper/simpler than
            # padding both arrays and masking columns in-kernel, and the
            # common aligned case below is a free reshape with no copy.)
            p2 = jax.lax.slice(p_flat, (0,), (n_main,)).reshape(rows, cols)
            t2 = jax.lax.slice(t_flat, (0,), (n_main,)).reshape(rows, cols)
        else:
            p2 = p_flat.reshape(rows, cols)
            t2 = t_flat.reshape(rows, cols)

        # Dtype-aware row-block size: ~2 MiB of input-dtype bytes per input
        # per step, rounded to the dtype's sublane tile; small inputs use one
        # full-extent block (always a legal BlockSpec).
        target_rows = max(sub, (_TARGET_BLOCK_BYTES // (cols * itemsize)) // sub * sub)
        br = rows if rows <= target_rows else target_rows

        total_blocks = pl.cdiv(rows, br)
        last_rows = rows - (total_blocks - 1) * br      # valid rows in last block

        # Shard the reduction over TensorCores only where a device has >1 TC.
        ncores = 2 if (_tensorcores_per_device() >= 2 and total_blocks >= 2) else 1
        spc = pl.cdiv(total_blocks, ncores)             # reduction steps per core
        has_overhang = (ncores * spc != total_blocks)

        acc_rows = sub if br % sub == 0 else br

        if has_overhang:
            def in_map(c, i):
                # Clamp so over-provisioned steps re-read the last block
                # (their compute is skipped inside the kernel).
                return (jnp.minimum(c * spc + i, total_blocks - 1), 0)
        else:
            def in_map(c, i):
                return (c * spc + i, 0)

        kernel = functools.partial(
            _bce_sum_kernel, spc=spc, total_blocks=total_blocks,
            last_rows=last_rows, sub=sub, has_overhang=has_overhang)

        # VMEM budget derived from the actual block size: 2 inputs x 2
        # pipeline buffers of input-dtype blocks, ~4 f32 block-sized
        # elementwise temporaries, plus slack.
        block_bytes = br * cols * itemsize
        vmem_limit = int(min(48 << 20,
                             max(16 << 20,
                                 4 * block_bytes + 4 * br * cols * 4 + (2 << 20))))

        partial_sums = pl.pallas_call(
            kernel,
            out_shape=jax.ShapeDtypeStruct((ncores, 1, 1), jnp.float32),
            grid_spec=pltpu.PrefetchScalarGridSpec(
                num_scalar_prefetch=0,
                grid=(ncores, spc),
                in_specs=[
                    pl.BlockSpec((br, cols), in_map),
                    pl.BlockSpec((br, cols), in_map),
                ],
                out_specs=pl.BlockSpec((1, 1, 1), lambda c, i: (c, 0, 0)),
                scratch_shapes=[pltpu.VMEM((acc_rows, cols), jnp.float32)],
            ),
            compiler_params=pltpu.CompilerParams(
                dimension_semantics=("parallel", "arbitrary"),
                vmem_limit_bytes=vmem_limit,
            ),
        )(p2, t2)
        bce_sum = jnp.sum(partial_sums)

    if tail:
        # < cols leftover elements: O(cols) work, done with plain jnp.
        pt = jax.lax.slice(p_flat, (n_main,), (n,)).astype(jnp.float32)
        tt = jax.lax.slice(t_flat, (n_main,), (n,)).astype(jnp.float32)
        lp = jnp.maximum(jnp.log(pt), _LOG_CLAMP)
        l1 = jnp.maximum(jnp.log(1.0 - pt), _LOG_CLAMP)
        bce_sum = bce_sum + jnp.sum(-(tt * lp + (1.0 - tt) * l1))

    # Scalar epilogue: mean + focal transform (exp/pow on a scalar) in XLA.
    # NOTE: float32 sum/n is inexact above 2^24 elements (~1e-7 relative).
    bce = bce_sum / n
    bce_exp = jnp.exp(-bce)
    one_m = 1.0 - bce_exp
    modulator = one_m * one_m if gamma == 2 else one_m ** gamma
    return alpha * modulator * bce


def _focal_loss_ref(inputs, targets, alpha=ALPHA, gamma=GAMMA):
    p = inputs.astype(jnp.float32)
    t = targets.astype(jnp.float32)
    log_p = jnp.maximum(jnp.log(p), _LOG_CLAMP)
    log_1mp = jnp.maximum(jnp.log(1.0 - p), _LOG_CLAMP)
    bce = jnp.mean(-(t * log_p + (1.0 - t) * log_1mp))
    return alpha * (1.0 - jnp.exp(-bce)) ** gamma * bce


if __name__ == "__main__":
    key = jax.random.PRNGKey(0)

    # (shape, dtype): primary small NCHW shape plus edge-case paths.
    cases = [
        ((2, 4, 16, 16), jnp.float32),    # aligned fast path, single block
        ((3, 1, 7, 11), jnp.float32),     # ragged numel: prefix kernel + jnp tail
        ((8, 4, 129, 128), jnp.float32),  # multi-block + ragged last block (+2-TC split)
        ((4, 8, 32, 32), jnp.bfloat16),   # dtype-aware block sizing / bf16 sublane tile
    ]

    for shape, dtype in cases:
        k1, k2, key = jax.random.split(key, 3)
        inputs = jax.nn.sigmoid(jax.random.normal(k1, shape, jnp.float32)).astype(dtype)
        targets = (jax.random.uniform(k2, shape) > 0.5).astype(dtype)

        loss = jax.block_until_ready(focal_loss(inputs, targets))
        ref = _focal_loss_ref(inputs, targets)
        assert jnp.allclose(loss, ref, rtol=2e-5, atol=1e-6), (shape, dtype, loss, ref)

    print("KERNEL_OK")
</pallas_src>

<mosaic_0001>
module attributes {stable_mosaic.version = 11 : i64} {
  func.func @_bce_sum_kernel(%arg0: i32, %arg1: i32, %arg2: memref<8x256xf32, #tpu.memory_space<vmem>>, %arg3: memref<8x256xf32, #tpu.memory_space<vmem>>, %arg4: memref<1x1x1xf32, #tpu.memory_space<vmem>>, %arg5: memref<8x256xf32, #tpu.memory_space<vmem>>) attributes {dimension_semantics = [#tpu.dimension_semantics<parallel>, #tpu.dimension_semantics<arbitrary>], iteration_bounds = array<i64: 1, 1>, scalar_prefetch = 0 : i64, scratch_operands = 1 : i64, tpu.core_type = #tpu.core_type<tc>, window_params = [{transform_indices = @transform_0, window_bounds = array<i64: 8, 256>}, {transform_indices = @transform_1, window_bounds = array<i64: 8, 256>}, {transform_indices = @transform_2, window_bounds = array<i64: 1, 1, 1>}]} {
    %c0_i32 = arith.constant 0 : i32
    %0 = arith.cmpi eq, %arg1, %c0_i32 : i32
    %1 = arith.extui %0 : i1 to i32
    %c0_i32_0 = arith.constant 0 : i32
    %2 = arith.cmpi ne, %1, %c0_i32_0 : i32
    scf.if %2 {
      %cst_15 = arith.constant 0.000000e+00 : f32
      %28 = vector.broadcast %cst_15 : f32 to vector<8x256xf32>
      %c0_16 = arith.constant 0 : index
      %c0_17 = arith.constant 0 : index
      %29 = vector.load %arg5[%c0_16, %c0_17] : memref<8x256xf32, #tpu.memory_space<vmem>>, vector<8x256xf32>
      tpu.vector_store %arg5[%c0_16, %c0_17], %28 {strides = array<i32>} : memref<8x256xf32, #tpu.memory_space<vmem>>, vector<8x256xf32>,
    } else {
    }
    %c0 = arith.constant 0 : index
    %c0_1 = arith.constant 0 : index
    %3 = vector.load %arg2[%c0, %c0_1] : memref<8x256xf32, #tpu.memory_space<vmem>>, vector<8x256xf32>
    %c0_2 = arith.constant 0 : index
    %c0_3 = arith.constant 0 : index
    %4 = vector.load %arg3[%c0_2, %c0_3] : memref<8x256xf32, #tpu.memory_space<vmem>>, vector<8x256xf32>
    %5 = math.log %3 : vector<8x256xf32>
    %cst = arith.constant -1.000000e+02 : f32
    %6 = vector.broadcast %cst : f32 to vector<8x256xf32>
    %7 = arith.maximumf %5, %6 : vector<8x256xf32>
    %cst_4 = arith.constant 1.000000e+00 : f32
    %8 = vector.broadcast %cst_4 : f32 to vector<8x256xf32>
    %9 = arith.subf %8, %3 : vector<8x256xf32>
    %10 = math.log %9 : vector<8x256xf32>
    %cst_5 = arith.constant -1.000000e+02 : f32
    %11 = vector.broadcast %cst_5 : f32 to vector<8x256xf32>
    %12 = arith.maximumf %10, %11 : vector<8x256xf32>
    %13 = arith.mulf %4, %7 : vector<8x256xf32>
    %cst_6 = arith.constant 1.000000e+00 : f32
    %14 = vector.broadcast %cst_6 : f32 to vector<8x256xf32>
    %15 = arith.subf %14, %4 : vector<8x256xf32>
    %16 = arith.mulf %15, %12 : vector<8x256xf32>
    %17 = arith.addf %13, %16 : vector<8x256xf32>
    %cst_7 = arith.constant 0.000000e+00 : f32
    %18 = vector.broadcast %cst_7 : f32 to vector<8x256xf32>
    %19 = arith.subf %18, %17 : vector<8x256xf32>
    %c0_8 = arith.constant 0 : index
    %c0_9 = arith.constant 0 : index
    %20 = vector.load %arg5[%c0_8, %c0_9] : memref<8x256xf32, #tpu.memory_space<vmem>>, vector<8x256xf32>
    %21 = vector.shape_cast %19 : vector<8x256xf32> to vector<1x8x256xf32>
    %cst_10 = arith.constant dense<0.000000e+00> : vector<8x256xf32>
    %22 = vector.multi_reduction <add>, %21, %cst_10 [0] : vector<1x8x256xf32> to vector<8x256xf32>
    %23 = arith.addf %20, %22 : vector<8x256xf32>
    %c0_11 = arith.constant 0 : index
    %c0_12 = arith.constant 0 : index
    %24 = vector.load %arg5[%c0_11, %c0_12] : memref<8x256xf32, #tpu.memory_space<vmem>>, vector<8x256xf32>
    tpu.vector_store %arg5[%c0_11, %c0_12], %23 {strides = array<i32>} : memref<8x256xf32, #tpu.memory_space<vmem>>, vector<8x256xf32>,
    %c0_i32_13 = arith.constant 0 : i32
    %25 = arith.cmpi eq, %arg1, %c0_i32_13 : i32
    %26 = arith.extui %25 : i1 to i32
    %c0_i32_14 = arith.constant 0 : i32
    %27 = arith.cmpi ne, %26, %c0_i32_14 : i32
    scf.if %27 {
      %c0_15 = arith.constant 0 : index
      %c0_16 = arith.constant 0 : index
      %28 = vector.load %arg5[%c0_15, %c0_16] : memref<8x256xf32, #tpu.memory_space<vmem>>, vector<8x256xf32>
      %29 = vector.shape_cast %28 : vector<8x256xf32> to vector<1x8x256xf32>
      %cst_17 = arith.constant dense<0.000000e+00> : vector<1xf32>
      %30 = vector.multi_reduction <add>, %29, %cst_17 [1, 2] : vector<1x8x256xf32> to vector<1xf32>
      %31 = vector.shape_cast %30 : vector<1xf32> to vector<1x1x1xf32>
      %32 = vector.extract %31[0, 0, 0] : f32 from vector<1x1x1xf32>
      %33 = vector.broadcast %32 : f32 to vector<1x1x1xf32>
      %c0_18 = arith.constant 0 : index
      %c0_19 = arith.constant 0 : index
      %c0_20 = arith.constant 0 : index
      %34 = vector.load %arg4[%c0_18, %c0_19, %c0_20] : memref<1x1x1xf32, #tpu.memory_space<vmem>>, vector<1x1x1xf32>
      tpu.vector_store %arg4[%c0_18, %c0_19, %c0_20], %33 {strides = array<i32>} : memref<1x1x1xf32, #tpu.memory_space<vmem>>, vector<1x1x1xf32>,
    } else {
    }
    return
  }
  func.func @transform_0(%arg0: i32, %arg1: i32) -> (i32, i32) {
    %c1_i32 = arith.constant 1 : i32
    %0 = arith.muli %arg0, %c1_i32 : i32
    %1 = arith.addi %0, %arg1 : i32
    %c0_i32 = arith.constant 0 : i32
    %c0_i32_0 = arith.constant 0 : i32
    return %1, %c0_i32 : i32, i32
  }
  func.func @transform_1(%arg0: i32, %arg1: i32) -> (i32, i32) {
    %c1_i32 = arith.constant 1 : i32
    %0 = arith.muli %arg0, %c1_i32 : i32
    %1 = arith.addi %0, %arg1 : i32
    %c0_i32 = arith.constant 0 : i32
    %c0_i32_0 = arith.constant 0 : i32
    return %1, %c0_i32 : i32, i32
  }
  func.func @transform_2(%arg0: i32, %arg1: i32) -> (i32, i32, i32) {
    %c0_i32 = arith.constant 0 : i32
    %c0_i32_0 = arith.constant 0 : i32
    %c0_i32_1 = arith.constant 0 : i32
    return %arg0, %c0_i32, %c0_i32_0 : i32, i32, i32
  }
}

</mosaic_0001>

<bundles_post_ra>
// kernel: focal_loss.1
= control target key start
LH: loop header
LB: loop body
LE: loop exit
PB: predicated region body
PF: predicated region fallthrough
CT: control target
= control target key end

     0   :  { %s208_s0 = inlined_call_operand.vmem [shape: f32[8,256], index: 0, kind: input, shape index: {}]   ;;  %s209_s1 = inlined_call_operand.vmem [shape: f32[8,256], index: 1, kind: input, shape index: {}]   ;;  %s210_s2 = inlined_call_operand.hbm [shape: f32[1,1,1], index: 2, kind: output, shape index: {}]  }
   0x1   :  { %v58_v0 = vld [vmem:[%s208_s0] sm:$0xff]  ;;  %v59_v1 = vld [vmem:[%s208_s0 + $0x8] sm:$0xff] }
   0x2   :  { %143 = vlog2.f32 %v58_v0  ;;  %v68_v2 = vsub.f32 1.0, %v58_v0  ;;  %v69_v3 = vsub.f32 1.0, %v59_v1 }
   0x3   :  { %7 = vsyncpa [#allocation4], 0  ;;  %145 = vlog2.f32 %v59_v1  ;;  %v60_v5 = vld [vmem:[%s209_s1] sm:$0xff]  ;;  %v61_v7 = vld [vmem:[%s209_s1 + $0x8] sm:$0xff]  ;;  %s177_s0 = smov [#allocation3]   ;;  %s119_s19 = sshll.u32 %s210_s2, 4  ;;  %s120_s19 = int_to_ptr.hbm [resolvable:$true] %s119_s19 }
   0x4   :  { %147 = vlog2.f32 %v68_v2  ;;  %v78_v14 = vsub.f32 1.0, %v60_v5  ;;  %v79_v17 = vsub.f32 1.0, %v61_v7  ;;  %s117_s1 = sshll.u32 %s177_s0, 4  ;;  %vm110_vm0 = vcmask 0   ;;  %s118_s1 = int_to_ptr.vmem [resolvable:$true] %s117_s1 }
   0x5   :  { %149 = vlog2.f32 %v69_v3 }
   0x8   :  { %v144_v4 = vpop.eup %143 }
   0x9   :  { %v146_v6 = vpop.eup %145  ;;  %v63_v8 = vmul.f32 0.6931472, %v144_v4 }
   0xa   :  { %v148_v9 = vpop.eup %147  ;;  %v65_v10 = vmul.f32 0.6931472, %v146_v6 }
   0xb   :  { %v150_v11 = vpop.eup %149  ;;  %v66_v12 = vmax.f32 %v63_v8, -100.0  ;;  %v71_v13 = vmul.f32 0.6931472, %v148_v9 }
   0xc   :  { %v67_v15 = vmax.f32 %v65_v10, -100.0  ;;  %v73_v16 = vmul.f32 0.6931472, %v150_v11 }
   0xd   :  { %v74_v18 = vmax.f32 %v71_v13, -100.0  ;;  %v76_v19 = vmul.f32 %v66_v12, %v60_v5 }
   0xe   :  { %v75_v20 = vmax.f32 %v73_v16, -100.0  ;;  %v77_v21 = vmul.f32 %v67_v15, %v61_v7 }
   0xf   :  { %v80_v22 = vmul.f32 %v78_v14, %v74_v18 }
  0x10   :  { %v81_v23 = vmul.f32 %v79_v17, %v75_v20 }
  0x11   :  { %v82_v24 = vadd.f32 %v80_v22, %v76_v19 }
  0x12   :  { %v83_v25 = vadd.f32 %v81_v23, %v77_v21 }
  0x13   :  { %v84_v26 = vsub.f32 0.0, %v82_v24 }
  0x14   :  { %v85_v27 = vsub.f32 0.0, %v83_v25 }
  0x16   :  { %v99_v28 = vadd.f32 %v85_v27, %v84_v26 }
  0x18   :  { %100 = vadd.xlane.f32.xlu0 %v99_v28 }
  0x8b   :  { %v101_v29 = vpop.xlane.xlu0 %100 }
  0x8c   :  { %v102_v30 = vrot.slane %v101_v29, 4 }
  0x8e   :  { %v103_v31 = vadd.f32 %v102_v30, %v101_v29 }
  0x90   :  { %v104_v32 = vrot.slane %v103_v31, 2 }
  0x92   :  { %v105_v33 = vadd.f32 %v104_v32, %v103_v31 }
  0x94   :  { %v106_v34 = vrot.slane %v105_v33, 1 }
  0x96   :  { %v107_v35 = vadd.f32 %v106_v34, %v105_v33 }
  0x98   :  { %140 = vpush %v107_v35 }
  0xc9   :  { %s141_s20 = spop %140 }
  0xca   :  { %v109_v36 = vstv %s141_s20 }
  0xcb   :  { %111 = vst.msk [vmem:[#allocation3] sm:$0x1] %vm110_vm0, %v109_v36 }
  0xcc   :  { %122 = dma.vmem_to_hbm [thread:$0]  %s118_s1, 16, %s120_s19, [#allocation4]  }
  0xcd   :  { %175 = dma.done.wait [#allocation4], 16  }
  0xce   :  { %176 = vsyncadd [#allocation4], 4294967280 }
  0xcf   :  { %127 = vsyncpa [#allocation4], 1 }

</bundles_post_ra>
